<compile_context>
chip_gen: v6e
topology: v6e:2x2x1
jax: 0.10.0
libtpu: 0.0.40
codegen_flags: <defaults>
</compile_context>

<pallas_src>
import functools

import numpy as np

import jax
import jax.numpy as jnp
from jax.experimental import pallas as pl
from jax.experimental.pallas import tpu as pltpu

_EPS = 1e-5  # PyTorch BatchNorm1d default eps


# ----------------------------------------------------------------------------
# Pallas kernel.
# ----------------------------------------------------------------------------
def _pile_conv_kernel(tn, tb, nk, with_mid, with_dw, *refs):
    it = iter(refs)
    x_ref = next(it)                            # (C, tb*tn)        matmul dtype
    dw_ref = next(it) if with_dw else None      # (C, tb*tn)        matmul dtype
    xc_ref = next(it)                           # (C, tb*num_out)   matmul dtype
    w_in_ref = next(it)                         # (2C, C)    md, BN scale folded
    sh_in_ref = next(it)                        # (2C, 1)    f32
    if with_mid:
        w_mid_ref = next(it)                    # (C//2, 2C) md, BN scale folded
        sh_mid_ref = next(it)                   # (C//2, 1)  f32
    w_oa_ref = next(it)                         # (out_dim, C)   md, scale folded
    w_ob_ref = next(it)                         # (out_dim, Cg)  md, scale folded
    sh_o_ref = next(it)                         # (out_dim, 1)   f32
    expand_ref = next(it)                       # (tb, tb*num_out) f32 0/1
    o_ref = next(it)                            # (out_dim, tb*num_out)
    gmax_ref = next(it)                         # (2C, tb) f32 (used iff nk > 1)

    # conv_in matmul over this N-chunk; BN scale already folded into w_in.
    x0 = x_ref[...]
    # NOTE: bf16 VALU is native on v6e/v7x; on v5e consider matmul_dtype=f32.
    xin = x0 * dw_ref[...] if with_dw else x0
    raw = jnp.dot(w_in_ref[...], xin, preferred_element_type=jnp.float32)

    # Per-batch-element max over this chunk's tn points, assembled as a VALUE
    # (XLU lane-reduces + tiny selects) — no masked VMEM scratch stores.
    two_c = raw.shape[0]
    lane = jax.lax.broadcasted_iota(jnp.int32, (two_c, tb), 1)
    part = jnp.zeros((two_c, tb), jnp.float32)
    for t in range(tb):                                   # small static unroll
        m_t = jnp.max(raw[:, t * tn:(t + 1) * tn], axis=1, keepdims=True)
        part = jnp.where(lane == t, m_t, part)

    def _tail(pooled):
        # conv_in bias/BN-shift (+ ReLU) deferred past the max pool — exact,
        # since both commute with max — so this epilogue runs on (2C, tb).
        g = pooled + sh_in_ref[...]
        if with_mid:
            g = jnp.maximum(g, 0.0)                       # conv_in ReLU
            g = jnp.dot(w_mid_ref[...], g.astype(w_mid_ref.dtype),
                        preferred_element_type=jnp.float32)
            g = jnp.maximum(g + sh_mid_ref[...], 0.0)     # conv_mid BN + ReLU

        # conv_out on concat([x[:, :num_out], repeat(g)]) as a split matmul.
        za = jnp.dot(w_oa_ref[...], xc_ref[...],
                     preferred_element_type=jnp.float32)  # (out_dim, tb*no)
        gb = jnp.dot(w_ob_ref[...], g.astype(w_ob_ref.dtype),
                     preferred_element_type=jnp.float32)  # (out_dim, tb)
        # Replicate gb across each element's num_out lanes with the hoisted
        # 0/1 matrix (MXU is ~idle; avoids an in-kernel lane relayout).
        zb = jnp.dot(gb, expand_ref[...], preferred_element_type=jnp.float32)
        z = jnp.maximum(za + zb + sh_o_ref[...], 0.0)
        o_ref[...] = z.astype(o_ref.dtype)                # lane-dense vst

    if nk == 1:
        _tail(part)
    else:
        k = pl.program_id(1)

        @pl.when(k == 0)
        def _():
            gmax_ref[...] = part

        @pl.when(k > 0)
        def _():
            gmax_ref[...] = jnp.maximum(gmax_ref[...], part)

        @pl.when(k == nk - 1)
        def _():
            _tail(gmax_ref[...])


# ----------------------------------------------------------------------------
# Wrapper helpers.
# ----------------------------------------------------------------------------
def _bn_fold(bias, gamma, beta, mean, var):
    sc = gamma / jnp.sqrt(var + _EPS)
    sh = beta + sc * (bias - mean)
    return sc.astype(jnp.float32), sh.astype(jnp.float32)


def _pick_batch_tile(B, N, num_out, target=8, min_steps=4):
    """Largest tb <= target dividing B with 128-aligned input/output lane
    widths, preferring >= min_steps batch grid steps (keeps both v7x cores
    fed and the per-core pipeline >= 2 deep)."""
    def ok(tb):
        return (B % tb == 0 and (tb * N) % 128 == 0
                and (tb * num_out) % 128 == 0)

    for steps in (min_steps, 2, 1):
        for tb in range(min(target, max(B // steps, 1)), 0, -1):
            if ok(tb) and B // tb >= steps:
                return tb
    # TODO(synk): pad B (or force an N split) instead of this grid=(1,) path.
    return B


def _pick_n_tile(C, N, tb, with_dw, md_itemsize, budget_bytes):
    """Per-element N chunk: full N unless the per-step footprint is large, in
    which case halve while staying a 128-aligned divisor of N (v7x VMEM)."""
    def step_bytes(tn):
        stream = 2 * (1 + int(with_dw)) * C * tb * tn * md_itemsize
        act = (2 * C) * tb * tn * 4                       # f32 conv_in act
        return stream + act

    tn = N
    while (step_bytes(tn) > budget_bytes and tn % 2 == 0
           and (tn // 2) % 128 == 0):
        tn //= 2
    return tn


def pile_conv_forward(params, x, num_out, dist_w=None, with_mid=True,
                      matmul_dtype=jnp.bfloat16, batch_tile=8,
                      n_chunk_budget_bytes=6 << 20):
    B, C, N = x.shape
    out_dim = params["w_out"].shape[0]
    assert num_out <= N, (num_out, N)
    with_dw = dist_w is not None
    if with_dw:
        assert dist_w.shape[0] == B and dist_w.shape[1] == C, dist_w.shape
        assert dist_w.shape[2] >= N, (dist_w.shape, N)

    md = matmul_dtype
    in_item = jnp.dtype(md).itemsize
    out_item = jnp.dtype(x.dtype).itemsize

    tb = _pick_batch_tile(B, N, num_out, batch_tile)
    tn = _pick_n_tile(C, N, tb, with_dw, in_item, n_chunk_budget_bytes)
    nb, nk = B // tb, N // tn
    grid = (nb, nk)

    # (B, C, N) -> (C, [nb, nk, tb, tn]) slab: every BlockSpec window is a
    # plain lane-dense slice (wrapper-side layout plumbing only).
    def _to_slab(a):
        a = jnp.transpose(a, (1, 0, 2)).reshape(C, nb, tb, nk, tn)
        return jnp.transpose(a, (0, 1, 3, 2, 4)).reshape(C, B * N)

    x_t = _to_slab(x.astype(md))

    # x[:, :, :num_out], lane-dense per batch tile: conv_out's direct operand,
    # streamed as its own input instead of being gathered in-kernel.
    xc_t = jnp.transpose(x[:, :, :num_out].astype(md), (1, 0, 2)).reshape(
        C, B * num_out)

    # Fold BN scales (and conv biases) into weights / shifts in f32.
    sc_in, sh_in = _bn_fold(params["b_in"], params["bn_in_g"],
                            params["bn_in_b"], params["bn_in_m"],
                            params["bn_in_v"])
    sc_o, sh_o = _bn_fold(params["b_out"], params["bn_out_g"],
                          params["bn_out_b"], params["bn_out_m"],
                          params["bn_out_v"])
    w_in = (params["w_in"] * sc_in[:, None]).astype(md)
    w_oa = (params["w_out"][:, :C] * sc_o[:, None]).astype(md)
    w_ob = (params["w_out"][:, C:] * sc_o[:, None]).astype(md)

    # 0/1 matrix replicating each element's pooled feature over its num_out
    # output lanes (hoisted out of the kernel; kept f32 => exact).
    expand = jnp.asarray(np.kron(np.eye(tb, dtype=np.float32),
                                 np.ones((1, num_out), np.float32)))

    args = [x_t]
    in_specs = [pl.BlockSpec((C, tb * tn), lambda i, k: (0, i * nk + k))]
    if with_dw:
        args.append(_to_slab(dist_w[:, :, :N].astype(md)))
        in_specs.append(
            pl.BlockSpec((C, tb * tn), lambda i, k: (0, i * nk + k)))
    args.append(xc_t)
    in_specs.append(pl.BlockSpec((C, tb * num_out), lambda i, k: (0, i)))

    def _const(a):
        # Constants keep their (cheap) 2-deep pipeline buffers; revisit with
        # pl.Buffered(1) only if C/out_dim grow under v7x's 64 MiB VMEM.
        args.append(a)
        in_specs.append(pl.BlockSpec(a.shape, lambda i, k: (0, 0)))

    _const(w_in)
    _const(sh_in[:, None])
    if with_mid:
        sc_m, sh_m = _bn_fold(params["b_mid"], params["bn_mid_g"],
                              params["bn_mid_b"], params["bn_mid_m"],
                              params["bn_mid_v"])
        _const((params["w_mid"] * sc_m[:, None]).astype(md))
        _const(sh_m[:, None])
    _const(w_oa)
    _const(w_ob)
    _const(sh_o[:, None])
    _const(expand)

    # Advisory cost hint + scoped-VMEM limit from the real per-step footprint.
    g_dim = (C // 2) if with_mid else (2 * C)
    flops = (2 * B * (2 * C) * C * N
             + (2 * B * g_dim * (2 * C) if with_mid else 0)
             + 2 * B * out_dim * (C * num_out + g_dim + num_out))
    n_stream = 2 + int(with_dw)
    const_bytes = sum(int(a.size) * a.dtype.itemsize for a in args[n_stream:])
    bytes_accessed = ((1 + int(with_dw)) * B * C * N * in_item
                      + B * C * num_out * in_item
                      + B * out_dim * num_out * out_item
                      + nb * nk * const_bytes)
    per_step = (2 * (1 + int(with_dw)) * C * tb * tn * in_item   # x(/dw), 2 buf
                + 2 * C * tb * num_out * in_item                 # xc
                + 2 * out_dim * tb * num_out * out_item          # out
                + 2 * (2 * C) * tb * tn * 4                      # f32 conv_in y
                + 2 * const_bytes)
    vmem_limit = int(min(64 << 20, max(32 << 20, 2 * per_step + (2 << 20))))

    kernel = functools.partial(_pile_conv_kernel, tn, tb, nk,
                               with_mid, with_dw)
    out_t = pl.pallas_call(
        kernel,
        out_shape=jax.ShapeDtypeStruct((out_dim, B * num_out), x.dtype),
        grid_spec=pltpu.PrefetchScalarGridSpec(
            num_scalar_prefetch=0,
            grid=grid,
            in_specs=in_specs,
            out_specs=pl.BlockSpec((out_dim, tb * num_out),
                                   lambda i, k: (0, i)),
            scratch_shapes=[pltpu.VMEM((2 * C, tb), jnp.float32)]),
        compiler_params=pltpu.CompilerParams(
            dimension_semantics=("parallel", "arbitrary"),
            vmem_limit_bytes=vmem_limit),
        cost_estimate=pl.CostEstimate(flops=int(flops), transcendentals=0,
                                      bytes_accessed=int(bytes_accessed)),
    )(*args)

    # (out_dim, B*num_out) -> (B, out_dim, num_out): wrapper-side layout only.
    return jnp.transpose(out_t.reshape(out_dim, B, num_out), (1, 0, 2))


# ----------------------------------------------------------------------------
# Deterministic parameter initialization (shapes follow PileConv.__init__).
# ----------------------------------------------------------------------------
def init_params(key, input_dim, output_dim, with_mid=True):
    C = input_dim
    k = iter(jax.random.split(key, 32))

    def conv(o, i):
        w = jax.random.normal(next(k), (o, i), jnp.float32) / jnp.sqrt(float(i))
        b = jax.random.normal(next(k), (o,), jnp.float32) * 0.1
        return w, b

    def bn(c):
        return (jax.random.uniform(next(k), (c,), jnp.float32, 0.5, 1.5),   # gamma
                jax.random.normal(next(k), (c,), jnp.float32) * 0.1,        # beta
                jax.random.normal(next(k), (c,), jnp.float32) * 0.1,        # mean
                jax.random.uniform(next(k), (c,), jnp.float32, 0.5, 1.5))   # var

    p = {}
    p["w_in"], p["b_in"] = conv(2 * C, C)
    p["bn_in_g"], p["bn_in_b"], p["bn_in_m"], p["bn_in_v"] = bn(2 * C)
    if with_mid:
        p["w_mid"], p["b_mid"] = conv(C // 2, 2 * C)
        p["bn_mid_g"], p["bn_mid_b"], p["bn_mid_m"], p["bn_mid_v"] = bn(C // 2)
        cat_dim = C + C // 2
    else:
        cat_dim = C + 2 * C
    p["w_out"], p["b_out"] = conv(output_dim, cat_dim)
    p["bn_out_g"], p["bn_out_b"], p["bn_out_m"], p["bn_out_v"] = bn(output_dim)
    return p


# ----------------------------------------------------------------------------
# Pure-JAX reference (mirrors the PyTorch forward, eval-mode BN).  matmul_dtype
# lets us check the bf16-operand kernel against an operand-matched reference.
# ----------------------------------------------------------------------------
def _conv_bn_relu_ref(x, w, b, g, be, m, v, relu, md):
    y = jnp.einsum("oc,bcn->bon", w.astype(md), x.astype(md),
                   preferred_element_type=jnp.float32, precision="highest")
    y = y + b[None, :, None]
    y = g[None, :, None] * (y - m[None, :, None]) / jnp.sqrt(
        v[None, :, None] + _EPS) + be[None, :, None]
    return jnp.maximum(y, 0.0) if relu else y


def pile_conv_ref(p, x, num_out, dist_w=None, with_mid=True,
                  matmul_dtype=jnp.float32):
    B, C, N = x.shape
    md = matmul_dtype
    if dist_w is None:
        xin = x.astype(md)
    else:
        xin = x.astype(md) * dist_w[:, :, :N].astype(md)
    y = _conv_bn_relu_ref(xin, p["w_in"], p["b_in"], p["bn_in_g"], p["bn_in_b"],
                          p["bn_in_m"], p["bn_in_v"], relu=with_mid, md=md)
    g = jnp.max(y, axis=2, keepdims=True)
    if with_mid:
        g = _conv_bn_relu_ref(g, p["w_mid"], p["b_mid"], p["bn_mid_g"],
                              p["bn_mid_b"], p["bn_mid_m"], p["bn_mid_v"],
                              relu=True, md=md)
    z = jnp.concatenate(
        [x[:, :, :num_out].astype(jnp.float32),
         jnp.broadcast_to(g, (B, g.shape[1], num_out))], axis=1)
    return _conv_bn_relu_ref(z, p["w_out"], p["b_out"], p["bn_out_g"],
                             p["bn_out_b"], p["bn_out_m"], p["bn_out_v"],
                             relu=True, md=md)


if __name__ == "__main__":
    key = jax.random.PRNGKey(0)
    kp, kp2, kx, kd, kx5 = jax.random.split(key, 5)

    input_dim, output_dim = 8, 16
    B, N, num_out = 16, 128, 64       # -> batch tile 4, grid (4, 1)

    params = init_params(kp, input_dim, output_dim, with_mid=True)
    x = jax.random.normal(kx, (B, input_dim, N), jnp.float32)
    dist_w = jax.random.uniform(kd, (B, input_dim, N + 8), jnp.float32)

    # 1) Strict f32 correctness check.
    out = jax.block_until_ready(
        pile_conv_forward(params, x, num_out, dist_w=dist_w, with_mid=True,
                          matmul_dtype=jnp.float32))
    ref = pile_conv_ref(params, x, num_out, dist_w=dist_w, with_mid=True,
                        matmul_dtype=jnp.float32)
    assert out.shape == (B, output_dim, num_out), out.shape
    assert jnp.allclose(out, ref, atol=1e-3, rtol=1e-3), float(
        jnp.max(jnp.abs(out - ref)))

    # 2) Default fast path: bf16 MXU operands, f32 epilogue.  The BN scales
    #    are folded into the bf16 weights (one extra rounding vs. the
    #    unfolded reference), hence the slightly wider tolerance.
    out_bf = jax.block_until_ready(
        pile_conv_forward(params, x, num_out, dist_w=dist_w, with_mid=True))
    ref_bf = pile_conv_ref(params, x, num_out, dist_w=dist_w, with_mid=True,
                           matmul_dtype=jnp.bfloat16)
    assert jnp.allclose(out_bf, ref_bf, atol=3e-2, rtol=3e-2), float(
        jnp.max(jnp.abs(out_bf - ref_bf)))

    # 3) dist_w=None path (kernel variant with no dw input at all).
    out2 = jax.block_until_ready(
        pile_conv_forward(params, x, num_out, dist_w=None, with_mid=True))
    ref2 = pile_conv_ref(params, x, num_out, dist_w=None, with_mid=True,
                         matmul_dtype=jnp.bfloat16)
    assert jnp.allclose(out2, ref2, atol=3e-2, rtol=3e-2)

    # 4) with_mid=False variant.
    params_nm = init_params(kp2, input_dim, output_dim, with_mid=False)
    out3 = jax.block_until_ready(
        pile_conv_forward(params_nm, x, num_out, dist_w=dist_w, with_mid=False))
    ref3 = pile_conv_ref(params_nm, x, num_out, dist_w=dist_w, with_mid=False,
                         matmul_dtype=jnp.bfloat16)
    assert jnp.allclose(out3, ref3, atol=3e-2, rtol=3e-2)

    # 5) Force the inner N-axis (running-max scratch) path: N=256 split into
    #    two 128-point chunks per element via a tiny per-step VMEM budget.
    x5 = jax.random.normal(kx5, (B, input_dim, 256), jnp.float32)
    out5 = jax.block_until_ready(
        pile_conv_forward(params, x5, num_out, dist_w=None, with_mid=True,
                          n_chunk_budget_bytes=64 * 1024))
    ref5 = pile_conv_ref(params, x5, num_out, dist_w=None, with_mid=True,
                         matmul_dtype=jnp.bfloat16)
    assert jnp.allclose(out5, ref5, atol=3e-2, rtol=3e-2)

    print("KERNEL_OK")
</pallas_src>

<mosaic_0001>
module attributes {stable_mosaic.version = 11 : i64} {
  func.func @_pile_conv_kernel(%arg0: i32, %arg1: i32, %arg2: memref<8x512xf32, #tpu.memory_space<vmem>>, %arg3: memref<8x512xf32, #tpu.memory_space<vmem>>, %arg4: memref<8x256xf32, #tpu.memory_space<vmem>>, %arg5: memref<16x8xf32, #tpu.memory_space<vmem>>, %arg6: memref<16x1xf32, #tpu.memory_space<vmem>>, %arg7: memref<4x16xf32, #tpu.memory_space<vmem>>, %arg8: memref<4x1xf32, #tpu.memory_space<vmem>>, %arg9: memref<16x8xf32, #tpu.memory_space<vmem>>, %arg10: memref<16x4xf32, #tpu.memory_space<vmem>>, %arg11: memref<16x1xf32, #tpu.memory_space<vmem>>, %arg12: memref<4x256xf32, #tpu.memory_space<vmem>>, %arg13: memref<16x256xf32, #tpu.memory_space<vmem>>, %arg14: memref<16x4xf32, #tpu.memory_space<vmem>>) attributes {dimension_semantics = [#tpu.dimension_semantics<parallel>, #tpu.dimension_semantics<arbitrary>], iteration_bounds = array<i64: 4, 1>, scalar_prefetch = 0 : i64, scratch_operands = 1 : i64, tpu.core_type = #tpu.core_type<tc>, window_params = [{transform_indices = @transform_0, window_bounds = array<i64: 8, 512>}, {transform_indices = @transform_1, window_bounds = array<i64: 8, 512>}, {transform_indices = @transform_2, window_bounds = array<i64: 8, 256>}, {pipeline_mode = #tpu.pipeline_mode<synchronous>, transform_indices = @transform_3, window_bounds = array<i64: 16, 8>}, {pipeline_mode = #tpu.pipeline_mode<synchronous>, transform_indices = @transform_4, window_bounds = array<i64: 16, 1>}, {pipeline_mode = #tpu.pipeline_mode<synchronous>, transform_indices = @transform_5, window_bounds = array<i64: 4, 16>}, {pipeline_mode = #tpu.pipeline_mode<synchronous>, transform_indices = @transform_6, window_bounds = array<i64: 4, 1>}, {pipeline_mode = #tpu.pipeline_mode<synchronous>, transform_indices = @transform_7, window_bounds = array<i64: 16, 8>}, {pipeline_mode = #tpu.pipeline_mode<synchronous>, transform_indices = @transform_8, window_bounds = array<i64: 16, 4>}, {pipeline_mode = #tpu.pipeline_mode<synchronous>, transform_indices = @transform_9, window_bounds = array<i64: 16, 1>}, {pipeline_mode = #tpu.pipeline_mode<synchronous>, transform_indices = @transform_10, window_bounds = array<i64: 4, 256>}, {transform_indices = @transform_11, window_bounds = array<i64: 16, 256>}]} {
    %c0 = arith.constant 0 : index
    %c0_0 = arith.constant 0 : index
    %0 = vector.load %arg2[%c0, %c0_0] : memref<8x512xf32, #tpu.memory_space<vmem>>, vector<8x512xf32>
    %c0_1 = arith.constant 0 : index
    %c0_2 = arith.constant 0 : index
    %1 = vector.load %arg3[%c0_1, %c0_2] : memref<8x512xf32, #tpu.memory_space<vmem>>, vector<8x512xf32>
    %2 = arith.mulf %0, %1 : vector<8x512xf32>
    %c0_3 = arith.constant 0 : index
    %c0_4 = arith.constant 0 : index
    %3 = vector.load %arg5[%c0_3, %c0_4] : memref<16x8xf32, #tpu.memory_space<vmem>>, vector<16x8xf32>
    %cst = arith.constant dense<0.000000e+00> : vector<16x512xf32>
    %4 = tpu.matmul %3, %2, %cst {dimension_numbers = #tpu.dot_dimension_numbers<[1], [0], [0], [1], [0, 0, 1, 1], [], []>} : vector<16x8xf32>, vector<8x512xf32>, vector<16x512xf32> -> vector<16x512xf32>
    %5 = tpu.iota {dimensions = array<i32: 1>} : vector<16x4xi32>
    %cst_5 = arith.constant 0.000000e+00 : f32
    %6 = vector.broadcast %cst_5 : f32 to vector<16x4xf32>
    %7 = vector.extract_strided_slice %4 {offsets = [0, 0], sizes = [16, 128], strides = [1, 1]} : vector<16x512xf32> to vector<16x128xf32>
    %cst_6 = arith.constant dense<0xFF800000> : vector<16xf32>
    %8 = vector.multi_reduction <maximumf>, %7, %cst_6 [1] : vector<16x128xf32> to vector<16xf32>
    %9 = vector.shape_cast %8 : vector<16xf32> to vector<16x1xf32>
    %c0_i32 = arith.constant 0 : i32
    %10 = vector.broadcast %c0_i32 : i32 to vector<16x4xi32>
    %11 = arith.cmpi eq, %5, %10 : vector<16x4xi32>
    %12 = vector.shape_cast %9 : vector<16x1xf32> to vector<16x1xf32>
    %13 = vector.broadcast %12 : vector<16x1xf32> to vector<16x4xf32>
    %14 = arith.select %11, %13, %6 : vector<16x4xi1>, vector<16x4xf32>
    %15 = vector.extract_strided_slice %4 {offsets = [0, 128], sizes = [16, 128], strides = [1, 1]} : vector<16x512xf32> to vector<16x128xf32>
    %cst_7 = arith.constant dense<0xFF800000> : vector<16xf32>
    %16 = vector.multi_reduction <maximumf>, %15, %cst_7 [1] : vector<16x128xf32> to vector<16xf32>
    %17 = vector.shape_cast %16 : vector<16xf32> to vector<16x1xf32>
    %c1_i32 = arith.constant 1 : i32
    %18 = vector.broadcast %c1_i32 : i32 to vector<16x4xi32>
    %19 = arith.cmpi eq, %5, %18 : vector<16x4xi32>
    %20 = vector.shape_cast %17 : vector<16x1xf32> to vector<16x1xf32>
    %21 = vector.broadcast %20 : vector<16x1xf32> to vector<16x4xf32>
    %22 = arith.select %19, %21, %14 : vector<16x4xi1>, vector<16x4xf32>
    %23 = vector.extract_strided_slice %4 {offsets = [0, 256], sizes = [16, 128], strides = [1, 1]} : vector<16x512xf32> to vector<16x128xf32>
    %cst_8 = arith.constant dense<0xFF800000> : vector<16xf32>
    %24 = vector.multi_reduction <maximumf>, %23, %cst_8 [1] : vector<16x128xf32> to vector<16xf32>
    %25 = vector.shape_cast %24 : vector<16xf32> to vector<16x1xf32>
    %c2_i32 = arith.constant 2 : i32
    %26 = vector.broadcast %c2_i32 : i32 to vector<16x4xi32>
    %27 = arith.cmpi eq, %5, %26 : vector<16x4xi32>
    %28 = vector.shape_cast %25 : vector<16x1xf32> to vector<16x1xf32>
    %29 = vector.broadcast %28 : vector<16x1xf32> to vector<16x4xf32>
    %30 = arith.select %27, %29, %22 : vector<16x4xi1>, vector<16x4xf32>
    %31 = vector.extract_strided_slice %4 {offsets = [0, 384], sizes = [16, 128], strides = [1, 1]} : vector<16x512xf32> to vector<16x128xf32>
    %cst_9 = arith.constant dense<0xFF800000> : vector<16xf32>
    %32 = vector.multi_reduction <maximumf>, %31, %cst_9 [1] : vector<16x128xf32> to vector<16xf32>
    %33 = vector.shape_cast %32 : vector<16xf32> to vector<16x1xf32>
    %c3_i32 = arith.constant 3 : i32
    %34 = vector.broadcast %c3_i32 : i32 to vector<16x4xi32>
    %35 = arith.cmpi eq, %5, %34 : vector<16x4xi32>
    %36 = vector.shape_cast %33 : vector<16x1xf32> to vector<16x1xf32>
    %37 = vector.broadcast %36 : vector<16x1xf32> to vector<16x4xf32>
    %38 = arith.select %35, %37, %30 : vector<16x4xi1>, vector<16x4xf32>
    %c0_10 = arith.constant 0 : index
    %c0_11 = arith.constant 0 : index
    %39 = vector.load %arg6[%c0_10, %c0_11] : memref<16x1xf32, #tpu.memory_space<vmem>>, vector<16x1xf32>
    %40 = vector.broadcast %39 : vector<16x1xf32> to vector<16x4xf32>
    %41 = arith.addf %38, %40 : vector<16x4xf32>
    %cst_12 = arith.constant 0.000000e+00 : f32
    %42 = vector.broadcast %cst_12 : f32 to vector<16x4xf32>
    %43 = arith.maximumf %41, %42 : vector<16x4xf32>
    %c0_13 = arith.constant 0 : index
    %c0_14 = arith.constant 0 : index
    %44 = vector.load %arg7[%c0_13, %c0_14] : memref<4x16xf32, #tpu.memory_space<vmem>>, vector<4x16xf32>
    %cst_15 = arith.constant dense<0.000000e+00> : vector<4x4xf32>
    %45 = tpu.matmul %44, %43, %cst_15 {dimension_numbers = #tpu.dot_dimension_numbers<[1], [0], [0], [1], [0, 0, 1, 1], [], []>} : vector<4x16xf32>, vector<16x4xf32>, vector<4x4xf32> -> vector<4x4xf32>
    %c0_16 = arith.constant 0 : index
    %c0_17 = arith.constant 0 : index
    %46 = vector.load %arg8[%c0_16, %c0_17] : memref<4x1xf32, #tpu.memory_space<vmem>>, vector<4x1xf32>
    %47 = vector.broadcast %46 : vector<4x1xf32> to vector<4x4xf32>
    %48 = arith.addf %45, %47 : vector<4x4xf32>
    %cst_18 = arith.constant 0.000000e+00 : f32
    %49 = vector.broadcast %cst_18 : f32 to vector<4x4xf32>
    %50 = arith.maximumf %48, %49 : vector<4x4xf32>
    %c0_19 = arith.constant 0 : index
    %c0_20 = arith.constant 0 : index
    %51 = vector.load %arg9[%c0_19, %c0_20] : memref<16x8xf32, #tpu.memory_space<vmem>>, vector<16x8xf32>
    %c0_21 = arith.constant 0 : index
    %c0_22 = arith.constant 0 : index
    %52 = vector.load %arg4[%c0_21, %c0_22] : memref<8x256xf32, #tpu.memory_space<vmem>>, vector<8x256xf32>
    %cst_23 = arith.constant dense<0.000000e+00> : vector<16x256xf32>
    %53 = tpu.matmul %51, %52, %cst_23 {dimension_numbers = #tpu.dot_dimension_numbers<[1], [0], [0], [1], [0, 0, 1, 1], [], []>} : vector<16x8xf32>, vector<8x256xf32>, vector<16x256xf32> -> vector<16x256xf32>
    %c0_24 = arith.constant 0 : index
    %c0_25 = arith.constant 0 : index
    %54 = vector.load %arg10[%c0_24, %c0_25] : memref<16x4xf32, #tpu.memory_space<vmem>>, vector<16x4xf32>
    %cst_26 = arith.constant dense<0.000000e+00> : vector<16x4xf32>
    %55 = tpu.matmul %54, %50, %cst_26 {dimension_numbers = #tpu.dot_dimension_numbers<[1], [0], [0], [1], [0, 0, 1, 1], [], []>} : vector<16x4xf32>, vector<4x4xf32>, vector<16x4xf32> -> vector<16x4xf32>
    %c0_27 = arith.constant 0 : index
    %c0_28 = arith.constant 0 : index
    %56 = vector.load %arg12[%c0_27, %c0_28] : memref<4x256xf32, #tpu.memory_space<vmem>>, vector<4x256xf32>
    %cst_29 = arith.constant dense<0.000000e+00> : vector<16x256xf32>
    %57 = tpu.matmul %55, %56, %cst_29 {dimension_numbers = #tpu.dot_dimension_numbers<[1], [0], [0], [1], [0, 0, 1, 1], [], []>} : vector<16x4xf32>, vector<4x256xf32>, vector<16x256xf32> -> vector<16x256xf32>
    %58 = arith.addf %53, %57 : vector<16x256xf32>
    %c0_30 = arith.constant 0 : index
    %c0_31 = arith.constant 0 : index
    %59 = vector.load %arg11[%c0_30, %c0_31] : memref<16x1xf32, #tpu.memory_space<vmem>>, vector<16x1xf32>
    %60 = vector.broadcast %59 : vector<16x1xf32> to vector<16x256xf32>
    %61 = arith.addf %58, %60 : vector<16x256xf32>
    %cst_32 = arith.constant 0.000000e+00 : f32
    %62 = vector.broadcast %cst_32 : f32 to vector<16x256xf32>
    %63 = arith.maximumf %61, %62 : vector<16x256xf32>
    %c0_33 = arith.constant 0 : index
    %c0_34 = arith.constant 0 : index
    %64 = vector.load %arg13[%c0_33, %c0_34] : memref<16x256xf32, #tpu.memory_space<vmem>>, vector<16x256xf32>
    tpu.vector_store %arg13[%c0_33, %c0_34], %63 {strides = array<i32>} : memref<16x256xf32, #tpu.memory_space<vmem>>, vector<16x256xf32>,
    return
  }
  func.func @transform_0(%arg0: i32, %arg1: i32) -> (i32, i32) {
    %c1_i32 = arith.constant 1 : i32
    %0 = arith.muli %arg0, %c1_i32 : i32
    %1 = arith.addi %0, %arg1 : i32
    %c0_i32 = arith.constant 0 : i32
    %c0_i32_0 = arith.constant 0 : i32
    return %c0_i32, %1 : i32, i32
  }
  func.func @transform_1(%arg0: i32, %arg1: i32) -> (i32, i32) {
    %c1_i32 = arith.constant 1 : i32
    %0 = arith.muli %arg0, %c1_i32 : i32
    %1 = arith.addi %0, %arg1 : i32
    %c0_i32 = arith.constant 0 : i32
    %c0_i32_0 = arith.constant 0 : i32
    return %c0_i32, %1 : i32, i32
  }
  func.func @transform_2(%arg0: i32, %arg1: i32) -> (i32, i32) {
    %c0_i32 = arith.constant 0 : i32
    %c0_i32_0 = arith.constant 0 : i32
    return %c0_i32, %arg0 : i32, i32
  }
  func.func @transform_3(%arg0: i32, %arg1: i32) -> (i32, i32) {
    %c0_i32 = arith.constant 0 : i32
    %c0_i32_0 = arith.constant 0 : i32
    %c0_i32_1 = arith.constant 0 : i32
    return %c0_i32, %c0_i32_0 : i32, i32
  }
  func.func @transform_4(%arg0: i32, %arg1: i32) -> (i32, i32) {
    %c0_i32 = arith.constant 0 : i32
    %c0_i32_0 = arith.constant 0 : i32
    %c0_i32_1 = arith.constant 0 : i32
    return %c0_i32, %c0_i32_0 : i32, i32
  }
  func.func @transform_5(%arg0: i32, %arg1: i32) -> (i32, i32) {
    %c0_i32 = arith.constant 0 : i32
    %c0_i32_0 = arith.constant 0 : i32
    %c0_i32_1 = arith.constant 0 : i32
    return %c0_i32, %c0_i32_0 : i32, i32
  }
  func.func @transform_6(%arg0: i32, %arg1: i32) -> (i32, i32) {
    %c0_i32 = arith.constant 0 : i32
    %c0_i32_0 = arith.constant 0 : i32
    %c0_i32_1 = arith.constant 0 : i32
    return %c0_i32, %c0_i32_0 : i32, i32
  }
  func.func @transform_7(%arg0: i32, %arg1: i32) -> (i32, i32) {
    %c0_i32 = arith.constant 0 : i32
    %c0_i32_0 = arith.constant 0 : i32
    %c0_i32_1 = arith.constant 0 : i32
    return %c0_i32, %c0_i32_0 : i32, i32
  }
  func.func @transform_8(%arg0: i32, %arg1: i32) -> (i32, i32) {
    %c0_i32 = arith.constant 0 : i32
    %c0_i32_0 = arith.constant 0 : i32
    %c0_i32_1 = arith.constant 0 : i32
    return %c0_i32, %c0_i32_0 : i32, i32
  }
  func.func @transform_9(%arg0: i32, %arg1: i32) -> (i32, i32) {
    %c0_i32 = arith.constant 0 : i32
    %c0_i32_0 = arith.constant 0 : i32
    %c0_i32_1 = arith.constant 0 : i32
    return %c0_i32, %c0_i32_0 : i32, i32
  }
  func.func @transform_10(%arg0: i32, %arg1: i32) -> (i32, i32) {
    %c0_i32 = arith.constant 0 : i32
    %c0_i32_0 = arith.constant 0 : i32
    %c0_i32_1 = arith.constant 0 : i32
    return %c0_i32, %c0_i32_0 : i32, i32
  }
  func.func @transform_11(%arg0: i32, %arg1: i32) -> (i32, i32) {
    %c0_i32 = arith.constant 0 : i32
    %c0_i32_0 = arith.constant 0 : i32
    return %c0_i32, %arg0 : i32, i32
  }
}

</mosaic_0001>

<bundles_post_ra>
// kernel: tpu_custom_call.1
= control target key start
LH: loop header
LB: loop body
LE: loop exit
PB: predicated region body
PF: predicated region fallthrough
CT: control target
= control target key end

     0   :  { %s1796_s0 = inlined_call_operand.hbm [shape: f32[8,2048], index: 0, kind: input, shape index: {}]   ;;  %s1797_s1 = inlined_call_operand.hbm [shape: f32[8,2048], index: 1, kind: input, shape index: {}]   ;;  %s1798_s2 = inlined_call_operand.vmem [shape: f32[8,1024], index: 2, kind: input, shape index: {}]   ;;  %s1799_s3 = inlined_call_operand.vmem [shape: f32[16,8], index: 3, kind: input, shape index: {}]   ;;  %s1800_s4 = inlined_call_operand.vmem [shape: f32[16,1], index: 4, kind: input, shape index: {}]   ;;  %s1801_s5 = inlined_call_operand.vmem [shape: f32[4,16], index: 5, kind: input, shape index: {}]   ;;  %s1802_s6 = inlined_call_operand.vmem [shape: f32[4,1], index: 6, kind: input, shape index: {}]   ;;  %s1803_s7 = inlined_call_operand.vmem [shape: f32[16,8], index: 7, kind: input, shape index: {}]   ;;  %s1804_s8 = inlined_call_operand.vmem [shape: f32[16,4], index: 8, kind: input, shape index: {}]   ;;  %s1805_s9 = inlined_call_operand.vmem [shape: f32[16,1], index: 9, kind: input, shape index: {}]   ;;  %s1806_s10 = inlined_call_operand.vmem [shape: f32[4,256], index: 10, kind: input, shape index: {}]   ;;  %s1807_s11 = inlined_call_operand.hbm [shape: f32[16,1024], index: 11, kind: output, shape index: {}]  }
   0x1   :  { %1813 = sst [smem:[#allocation17_spill]] %s1796_s0 }
   0x2   :  { %1814 = sst [smem:[#allocation18_spill]] %s1807_s11 }
   0x3   :  { %16 = vsyncpa [#allocation4], 0 }
   0x4   :  { %18 = vsyncpa [#allocation4 + $0x1], 0 }
   0x5   :  { %19 = vsyncpa [#allocation7], 0 }
   0x6   :  { %21 = vsyncpa [#allocation7 + $0x1], 0 }
   0x7   :  { %22 = vsyncpa [#allocation5], 0 }
   0x8   :  { %24 = vsyncpa [#allocation5 + $0x1], 0  ;;  %s1550_s17 = smov 0   ;;  %s1552_s18 = smov 0  }
   0x9   :  { %s1554_s19 = smov 0   ;;  %s1556_s20 = smov 0  }
   0xa   :  { %s1558_s21 = smov 0   ;;  %s1560_s22 = smov 0  }
   0xb LB: > { %1815 = sst [smem:[#allocation12_spill]] %s1459_s17  ;;  %s1207_s23 = sadd.s32 4294967295, %s1479_s22   ;;  %s1479_s22 = sphi %s1560_s22, %s30_s22   ;;  %s1475_s21 = sphi %s1558_s21, %s1832_s21   ;;  %s1471_s20 = sphi %s1556_s20, %s1831_s20   ;;  %s1467_s19 = sphi %s1554_s19, %s1830_s19   ;;  %s1463_s18 = sphi %s1552_s18, %s1834_s18   ;;  %s1459_s17 = sphi %s1550_s17, %s1833_s17  }
   0xc   : > { %1816 = sst [smem:[#allocation13_spill]] %s1467_s19  ;;  %s1208_s24 = sadd.s32 4294967294, %s1479_s22  }
   0xd   : > { %1817 = sst [smem:[#allocation14_spill]] %s1475_s21  ;;  %s42_s25 = sadd.s32 1, %s1475_s21 }
   0xe   : > { %s51_s26 = sadd.s32 1, %s1467_s19  ;;  %p44_p0 = scmp.ge.s32.totalorder %s42_s25, 4 }
   0xf   : > { %p58_p1 = scmp.ne.s32.totalorder %s1467_s19, %s1463_s18  ;;  %p59_p2 = scmp.eq.s32.totalorder %s1479_s22, 0 }
  0x10   : > { %p64_p3 = scmp.ne.s32.totalorder %s1463_s18, %s1459_s17  ;;  %s1836_s25 = smov (%p44_p0, %s42_s25), 0 }
  0x11   : > { %1818 = sst [smem:[#allocation15_spill]] %s1836_s25  ;;  %p1591_p4 = por %p59_p2, %p58_p1 }
  0x12   : > { %p65_p5 = scmp.eq.s32.totalorder %s1207_s23, 0  ;;  %s48_s28 = ssub.s32 %s1475_s21, %s1836_s25 }
  0x13   : > { %p310_p6 = scmp.eq.s32.totalorder %s1207_s23, 3  ;;  %p49_p7 = scmp.eq.s32.totalorder %s48_s28, 0 }
  0x14   : > { %p1597_p8 = por %p65_p5, %p64_p3  ;;  %p316_p10 = scmp.eq.s32.totalorder %s1208_s24, 3 }
  0x15   : > { %p1601_p9 = por %p310_p6, %p58_p1  ;;  %p1280_p12 = scmp.lt.s32.totalorder %s1479_s22, 4 }
  0x16   : > { %s1606_s12 = scalar_select %p49_p7, %s1467_s19, %s51_s26  }
  0x17   : > { %p1608_p11 = por %p316_p10, %p64_p3  ;;  %s1614_s14 = sand.u32 1, %s1467_s19  }
  0x18   : > { %1822 = sst [smem:[#allocation16_spill]] %s1606_s12  ;;  %s1211_s15 = sshll.u32 %s1614_s14, 5 }
  0x19   : > { %s1242_s16 = sshll.u32 %s1475_s21, 9  ;;  %s1824_s0 = sld [smem:[#allocation17_spill]] }
  0x1a   : > { %s364_s17 = scalar_lea.vmem [#allocation3], %s1211_s15  ;;  %p1623_p13 = pnand %p1280_p12, %p1591_p4 }
  0x1b   : > { %s373_s11 = sshll.u32 %s364_s17, 4  ;;  %p1217_p0 = scmp.ge.s32.totalorder %s1479_s22, 1  ;;  %s374_s11 = int_to_ptr.vmem [resolvable:$true] %s373_s11 }
  0x1c   : > { %p407_p1 = scmp.lt.s32.totalorder %s1479_s22, 5  ;;  %s361_s26 = scalar_lea.sflag [#allocation4], %s1614_s14 }
  0x1d   : > { %p1341_p2 = pneg %p1623_p13  ;;  %s1352_s21 = scalar_lea.vmem %s374_s11, 512 }
  0x1e   : > { %p1353_p3 = scmp.ne.s32.totalorder %s374_s11, %s1352_s21  ;;  %s1481_s17 = smov [#allocation3]  }
  0x1f   : > { %s371_s25 = scalar_lea.hbm %s1824_s0, %s1242_s16  ;;  %s1357_s23 = sshll.u32 %s1481_s17, 4  ;;  %s1358_s23 = int_to_ptr.vmem [resolvable:$false] %s1357_s23 }
  0x20   : > { %p1355_p5 = pnand %p1353_p3, %p1341_p2  ;;  %s1359_s27 = scalar_lea.vmem %s1358_s23, 1024 }
  0x21   : > { %p1360_p4 = scmp.lt.s32.totalorder %s374_s11, %s1358_s23  ;;  %p1361_p7 = scmp.lt.s32.totalorder %s1359_s27, %s1352_s21 }
  0x22   : > { %p1356_p6 = pneg %p1355_p5 }
  0x23   : > { %p1362_p10 = por %p1361_p7, %p1360_p4 }
  0x25   : > { %p1363_p12 = pnand %p1362_p10, %p1356_p6 }
  0x27   : > { %1366 = shalt.err (!%p1363_p12)
}
  0x28   : > { %1272 = dma.hbm_to_vmem [thread:$0]  (!%p1623_p13), %s371_s25, 512, %s374_s11, %s361_s26  }
  0x29   : > { %p1641_p3 = pnand %p1217_p0, %p407_p1  ;;  %s391_s21 = scalar_lea.hbm %s1797_s1, %s1242_s16 }
  0x2a   : > { %s384_s23 = scalar_lea.vmem [#allocation6], %s1211_s15  ;;  %s381_s12 = scalar_lea.sflag [#allocation7], %s1614_s14 }
  0x2b   : > { %s393_s27 = sshll.u32 %s384_s23, 4  ;;  %s1482_s11 = smov [#allocation6]   ;;  %s394_s27 = int_to_ptr.vmem [resolvable:$true] %s393_s27 }
  0x2c   : > { %s1380_s19 = scalar_lea.vmem %s394_s27, 512  ;;  %s1385_s25 = sshll.u32 %s1482_s11, 4  ;;  %s1386_s25 = int_to_ptr.vmem [resolvable:$false] %s1385_s25 }
  0x2d   : > { %p1381_p5 = scmp.ne.s32.totalorder %s394_s27, %s1380_s19  ;;  %s1387_s26 = scalar_lea.vmem %s1386_s25, 1024 }
  0x2e   : > { %p1388_p0 = scmp.lt.s32.totalorder %s394_s27, %s1386_s25  ;;  %p1389_p1 = scmp.lt.s32.totalorder %s1387_s26, %s1380_s19 }
  0x2f   : > { %p1383_p6 = pnand %p1381_p5, %p1341_p2 }
  0x30   : > { %p1390_p7 = por %p1389_p1, %p1388_p0 }
  0x31   : > { %p1384_p4 = pneg %p1383_p6 }
  0x33   : > { %p1391_p10 = pnand %p1390_p7, %p1384_p4 }
  0x35   : > { %1394 = shalt.err (!%p1391_p10)
}
  0x36   : > { %1275 = dma.hbm_to_vmem [thread:$0]  (!%p1623_p13), %s391_s21, 512, %s394_s27, %s381_s12  }
  0x37   : > { %411 = sbr.rel (%p1641_p3) target bundleno = 1042 (0x412), region = 64  ;;  %s1657_s0 = sand.u32 (!%p1641_p3), 1, %s1463_s18  }
  0x38   : > { %s1660_s14 = sshll.u32 (!%p1641_p3), %s1657_s0, 5  ;;  %s414_s15 = scalar_lea.sflag (!%p1641_p3), [#allocation4], %s1657_s0 }
  0x39   : > { %s417_s19 = scalar_lea.vmem (!%p1641_p3), [#allocation3], %s1660_s14 }
  0x3c   : > { %1446 = dma.done.wait (%p1597_p8), %s414_s15, 512  }
  0x3d   : > { %1448 = vsyncadd (%p1597_p8), %s414_s15, 4294966784  ;;  %s423_s12 = scalar_lea.sflag [#allocation7], %s1657_s0  ;;  %s426_s16 = scalar_lea.vmem [#allocation6], %s1660_s14 }
  0x3e   : > { %1450 = dma.done.wait (%p1597_p8), %s423_s12, 512  }
  0x3f   : > { %1452 = vsyncadd (%p1597_p8), %s423_s12, 4294966784  ;;  %v1483_v0 = vmov 0.0   ;;  %v487_v1 = vld [vmem:[%s417_s19 + $0x8] sm:$0xff]  ;;  %v489_v3 = vld [vmem:[%s417_s19 + $0x18] sm:$0xff]  ;;  %vm500_vm0 = vcmask 64512   ;;  %v1484_v15 = vmov 0   ;;  %v661_v31 = vlaneseq }
  0x40   : > { %571 = vmatprep.mubr.f32.mxu0 %v1483_v0  ;;  %648 = vmatprep.mubr.f32.mxu1 %v1483_v0  ;;  %v491_v2 = vld [vmem:[%s426_s16 + $0x8] sm:$0xff]  ;;  %v493_v5 = vld [vmem:[%s426_s16 + $0x18] sm:$0xff]  ;;  %v486_v6 = vld [vmem:[%s417_s19] sm:$0xff]  ;;  %vm1485_vm1 = vmmov 0   ;;  %vm714_vm6 = vcmask 130048   ;;  %vm795_vm7 = vcmask 31744  }
  0x41   : > { %v495_v4 = vmul.f32 %v491_v2, %v487_v1  ;;  %v490_v7 = vld [vmem:[%s426_s16] sm:$0xff]  ;;  %v497_v8 = vmul.f32 %v493_v5, %v489_v3  ;;  %v488_v10 = vld [vmem:[%s417_s19 + $0x10] sm:$0xff]  ;;  %v499_v14 = vld [vmem:[%s1799_s3 + $0x8] sm:$0xff]  ;;  %1337 = vset.pattern.permute.xlu1 %v1484_v15  ;;  %1336 = vset.pattern.permute.xlu0 %v1484_v15  ;;  %v662_v33 = vand.u32 127, %v661_v31  ;;  %vm802_vm8 = vcmask 1043456   ;;  %s1221_s27 = sshll.u32 %s1471_s20, 1 }
  0x42   : > { %v494_v9 = vmul.f32 %v490_v7, %v486_v6  ;;  %v492_v11 = vld [vmem:[%s426_s16 + $0x10] sm:$0xff]  ;;  %v498_v12 = vld [vmem:[%s1799_s3] sm:$0xff]  ;;  %v692_v26 = vld [vmem:[%s1800_s4 + $0x8] sm:$0xff]  ;;  %p480_p8 = scmp.lt.s32.totalorder %s1221_s27, 7  ;;  %s474_s17 = scalar_lea.vmem [#allocation8], %s1660_s14 }
  0x43   : > { %537 = vmatprep.subr.mxu0 %v495_v4  ;;  %v496_v13 = vmul.f32 %v492_v11, %v488_v10  ;;  %614 = vmatprep.subr.mxu1 %v497_v8  ;;  %v691_v24 = vld [vmem:[%s1800_s4] sm:$0xff]  ;;  %v1055_v28 = vld [vmem:[%s1805_s9 + $0x8] sm:$0xff]  ;;  %vm667_vm2 = vcmp.eq.s32.totalorder %v662_v33, 0  ;;  %vm674_vm3 = vcmp.eq.s32.totalorder %v662_v33, 1  ;;  %vm681_vm4 = vcmp.eq.s32.totalorder %v662_v33, 2  ;;  %s1092_s21 = sshll.u32 %s474_s17, 4  ;;  %s1744_s21 = int_to_ptr.vmem [resolvable:$true] %s1092_s21 }
  0x44   : > { %538 = vmatpush1.msra.mxu0 %v494_v9  ;;  %v708_v25 = vld [vmem:[%s1802_s6] sm:$0xf]  ;;  %vm688_vm5 = vcmp.eq.s32.totalorder %v662_v33, 3  ;;  %v794_v60 = vld [vmem:[%s1804_s8 + $0x8] sm:$0xff]  ;;  %s1838_s27 = smov (!%p480_p8, %s1221_s27), 7  ;;  %s1244_s23 = sshll.u32 %s1471_s20, 8 }
  0x45   : > { %615 = vmatpush1.msra.mxu1 %v496_v13  ;;  %1223 = vmatmul.mubr.msk.f32.vlgmr.msra.gmra.mxu0 %vm500_vm0, %v498_v12  ;;  %v1054_v27 = vld [vmem:[%s1805_s9] sm:$0xff]  ;;  %s1222_s11 = sshll.u32 %s1838_s27, 3  ;;  %v790_v3 = vld [vmem:[%s1803_s7 + $0x8] sm:$0xff]  ;;  %s1079_s26 = scalar_lea.sflag [#allocation5], %s1657_s0 }
  0x46   : > { %1225 = vmatmul.mubr.msk.f32.vlgmr.msra.gmra.mxu1 %vm500_vm0, %v498_v12  ;;  %577 = vmatprep.mubr.f32.mxu0 %v1483_v0  ;;  %v707_v53 = vld [vmem:[%s1801_s5] sm:$0xf]  ;;  %s483_s15 = scalar_lea.vmem %s1798_s2, %s1222_s11  ;;  %s1827_s11 = sld [smem:[#allocation18_spill]] }
  0x47   : > { %654 = vmatprep.mubr.f32.mxu1 %v1483_v0  ;;  %1251 = vmatprep.subr.mxu0 %v1483_v0  ;;  %v793_v54 = vld [vmem:[%s1804_s8] sm:$0xff]  ;;  %v792_v62 = vld [vmem:[%s483_s15 + $0x8] sm:$0xff]  ;;  %s1486_s20 = smov [#allocation8]  }
  0x48   : > { %v881_v61 = vld [vmem:[%s1806_s10] sm:$0xff]  ;;  %s1399_s19 = sshll.u32 %s1486_s20, 4  ;;  %s1400_s19 = int_to_ptr.vmem [resolvable:$false] %s1399_s19 }
  0x49   : > { %1224 = vmatmul.mubr.msk.f32.gmra.mxu0 %vm500_vm0, %v499_v14  ;;  %v883_v63 = vcombine.high %v881_v61, %v881_v61  ;;  %v791_v1 = vld [vmem:[%s483_s15] sm:$0xff]  ;;  %s1395_s15 = scalar_lea.vmem %s1744_s21, 512  ;;  %s1401_s12 = scalar_lea.vmem %s1400_s19, 1024 }
  0x4a   : > { %1226 = vmatmul.mubr.msk.f32.gmra.mxu1 %vm500_vm0, %v499_v14  ;;  %1255 = vmatprep.mubr.msk.f32.mxu0 %vm1485_vm1, %v1483_v0  ;;  %v789_v2 = vld [vmem:[%s1803_s7] sm:$0xff]  ;;  %p1396_p13 = scmp.ne.s32.totalorder %s1744_s21, %s1395_s15  ;;  %p1402_p3 = scmp.lt.s32.totalorder %s1744_s21, %s1400_s19 }
  0x4b   : > { %1260 = vmatprep.mubr.msk.f32.mxu1 %vm795_vm7, %v793_v54  ;;  %p1403_p5 = scmp.lt.s32.totalorder %s1401_s12, %s1395_s15 }
  0x4c   : > { %s1749_s25 = scalar_lea.hbm %s1827_s11, %s1244_s23  ;;  %p1397_p2 = pnand %p1396_p13, %p1601_p9 }
  0x4d   : > { %p1404_p6 = por %p1403_p5, %p1402_p3 }
  0x4e   : > { %p1398_p12 = pneg %p1397_p2 }
  0x50   : > { %p1405_p4 = pnand %p1404_p6, %p1398_p12 }
 0x105   : > { %v573_v16 = vpop.f32.mrf.mxu0 }
 0x106   : > { %v650_v17 = vpop.f32.mrf.mxu1  ;;  %663 = vmax.xlane.f32.xlu1 %v573_v16 }
 0x107   : > { %677 = vmax.xlane.f32.xlu0 %v650_v17  ;;  %v575_v19 = vpop.f32.mrf.mxu0 }
 0x108   : > { %v652_v18 = vpop.f32.mrf.mxu1 }
 0x109   : > { %v579_v21 = vpop.f32.mrf.mxu0 }
 0x10a   : > { %684 = vmax.xlane.f32.xlu1 %v652_v18  ;;  %v656_v20 = vpop.f32.mrf.mxu1 }
 0x10b   : > { %670 = vmax.xlane.f32.xlu0 %v575_v19  ;;  %v581_v23 = vpop.f32.mrf.mxu0 }
 0x10c   : > { %v658_v22 = vpop.f32.mrf.mxu1 }
 0x10e   : > { %679 = vmax.xlane.f32.xlu1 %v656_v20 }
 0x10f   : > { %665 = vmax.xlane.f32.xlu0 %v579_v21 }
 0x112   : > { %686 = vmax.xlane.f32.xlu1 %v658_v22 }
 0x113   : > { %672 = vmax.xlane.f32.xlu0 %v581_v23 }
 0x123   : > { %695 = vperm.xlu1 %1337, %v691_v24  }
 0x127   : > { %711 = vperm.xlu1 %1337, %v708_v25  }
 0x129   : > { %700 = vperm.xlu0 %1336, %v692_v26  }
 0x12b   : > { %1058 = vperm.xlu1 %1337, %v1054_v27  }
 0x12f   : > { %1063 = vperm.xlu1 %1337, %v1055_v28  }
 0x18f   : > { %v664_v29 = vpop.xlane.xlu1 %663 }
 0x190   : > { %v678_v30 = vpop.xlane.xlu0 %677  ;;  %v668_v37 = vsel %vm667_vm2, %v664_v29, 0.0 }
 0x193   : > { %v685_v32 = vpop.xlane.xlu1 %684 }
 0x194   : > { %v671_v34 = vpop.xlane.xlu0 %670 }
 0x195   : > { %v675_v41 = vsel %vm674_vm3, %v671_v34, %v668_v37 }
 0x196   : > { %v682_v43 = vsel %vm681_vm4, %v678_v30, %v675_v41 }
 0x197   : > { %v680_v35 = vpop.xlane.xlu1 %679  ;;  %v689_v46 = vsel %vm688_vm5, %v685_v32, %v682_v43 }
 0x198   : > { %v666_v36 = vpop.xlane.xlu0 %665 }
 0x199   : > { %v669_v40 = vsel %vm667_vm2, %v666_v36, 0.0 }
 0x19b   : > { %v687_v38 = vpop.xlane.xlu1 %686 }
 0x19c   : > { %v673_v39 = vpop.xlane.xlu0 %672 }
 0x19d   : > { %v676_v42 = vsel %vm674_vm3, %v673_v39, %v669_v40 }
 0x19e   : > { %v683_v44 = vsel %vm681_vm4, %v680_v35, %v676_v42 }
 0x19f   : > { %v696_v45 = vpop.permute.xlu1 %695  ;;  %v690_v47 = vsel %vm688_vm5, %v687_v38, %v683_v44 }
 0x1a0   : > { %v703_v49 = vadd.f32 %v696_v45, %v689_v46 }
 0x1a2   : > { %v705_v52 = vmax.f32 %v703_v49, 0.0 }
 0x1a3   : > { %v712_v55 = vpop.permute.xlu1 %711 }
 0x1a4   : > { %v701_v48 = vpop.permute.xlu0 %700 }
 0x1a5   : > { %v704_v50 = vadd.f32 %v701_v48, %v690_v47 }
 0x1a7   : > { %v706_v51 = vmax.f32 %v704_v50, 0.0  ;;  %v1059_v8 = vpop.permute.xlu1 %1058 }
 0x1a9   : > { %1252 = vmatpush3.msra.mxu0 %v706_v51 }
 0x1aa   : > { %1253 = vmatprep.subr.mxu0 %v1483_v0 }
 0x1ab   : > { %1254 = vmatpush3.msra.mxu0 %v705_v52  ;;  %v1064_v16 = vpop.permute.xlu1 %1063 }
 0x1ac   : > { %1256 = vmatmul.mubr.msk.f32.vlgmr.msra.gmra.mxu0 %vm714_vm6, %v707_v53  ;;  %1231 = vmatprep.subr.msk.mxu0 %vm802_vm8, %v883_v63 }
 0x1ad   : > { %958 = vmatprep.mubr.f32.mxu0 %v1483_v0  ;;  %1232 = vmatpush1.msk.msra.mxu0 %vm802_vm8, %v881_v61 }
 0x26c   : > { %v784_v56 = vpop.f32.mrf.mxu0 }
 0x26d   : > { %v785_v57 = vadd.f32 %v784_v56, %v712_v55 }
 0x26e   : > { %v1257_v58 = vpop.f32.mrf.mxu0 }
 0x26f   : > { %v788_v59 = vmax.f32 %v785_v57, 0.0 }
 0x271   : > { %1258 = vmatprep.subr.msk.mxu1 %vm802_vm8, %v788_v59 }
 0x272   : > { %1259 = vmatpush3.msk.msra.mxu1 %vm802_vm8, %v788_v59 }
 0x273   : > { %1261 = vmatmul.mubr.msk.f32.vlgmr.msra.gmra.mxu1 %vm795_vm7, %v794_v60  ;;  %1007 = vmatprep.subr.mxu1 %v792_v62 }
 0x274   : > { %1041 = vmatprep.mubr.f32.mxu1 %v1483_v0  ;;  %1008 = vmatpush1.msra.mxu1 %v791_v1 }
 0x277   : > { %1235 = vmatmul.mubr.msk.f32.vlgmr.msra.gmra.mxu1 %vm500_vm0, %v789_v2 }
 0x278   : > { %1047 = vmatprep.mubr.f32.mxu1 %v1483_v0 }
 0x27b   : > { %1236 = vmatmul.mubr.msk.f32.gmra.mxu1 %vm500_vm0, %v790_v3 }
 0x333   : > { %v1262_v4 = vpop.f32.mrf.mxu1 }
 0x335   : > { %v872_v5 = vpop.f32.mrf.mxu1 }
 0x336   : > { %1233 = vmatmul.mubr.msk.f32.vlgmr.msra.gmra.mxu0 %vm795_vm7, %v872_v5 }
 0x337   : > { %964 = vmatprep.mubr.f32.mxu0 %v1483_v0  ;;  %v1043_v6 = vpop.f32.mrf.mxu1 }
 0x339   : > { %v1045_v7 = vpop.f32.mrf.mxu1 }
 0x33a   : > { %1234 = vmatmul.mubr.msk.f32.gmra.mxu0 %vm795_vm7, %v1262_v4 }
 0x33b   : > { %v1049_v12 = vpop.f32.mrf.mxu1 }
 0x33d   : > { %v1051_v20 = vpop.f32.mrf.mxu1 }
 0x3f6   : > { %v960_v9 = vpop.f32.mrf.mxu0 }
 0x3f7   : > { %v1044_v10 = vadd.f32 %v1043_v6, %v960_v9 }
 0x3f8   : > { %v962_v11 = vpop.f32.mrf.mxu0 }
 0x3f9   : > { %v1066_v13 = vadd.f32 %v1059_v8, %v1044_v10  ;;  %v1046_v14 = vadd.f32 %v1045_v7, %v962_v11 }
 0x3fa   : > { %v966_v15 = vpop.f32.mrf.mxu0 }
 0x3fb   : > { %v1070_v17 = vmax.f32 %v1066_v13, 0.0  ;;  %v1067_v18 = vadd.f32 %v1059_v8, %v1046_v14  ;;  %v1050_v19 = vadd.f32 %v1049_v12, %v966_v15 }
 0x3fc   : > { %v968_v0 = vpop.f32.mrf.mxu0 }
 0x3fd   : > { %1074 = vst [vmem:[%s474_s17] sm:$0xff] %v1070_v17  ;;  %v1071_v21 = vmax.f32 %v1067_v18, 0.0  ;;  %v1068_v22 = vadd.f32 %v1064_v16, %v1050_v19  ;;  %v1052_v23 = vadd.f32 %v1051_v20, %v968_v0 }
 0x3ff   : > { %1075 = vst [vmem:[%s474_s17 + $0x8] sm:$0xff] %v1071_v21  ;;  %v1072_v24 = vmax.f32 %v1068_v22, 0.0  ;;  %v1069_v25 = vadd.f32 %v1064_v16, %v1052_v23 }
 0x401   : > { %1076 = vst [vmem:[%s474_s17 + $0x10] sm:$0xff] %v1072_v24  ;;  %v1073_v26 = vmax.f32 %v1069_v25, 0.0 }
 0x403   : > { %1077 = vst [vmem:[%s474_s17 + $0x18] sm:$0xff] %v1073_v26 }
 0x404   : > { %1408 = shalt.err (!%p1405_p4)
}
 0x405   : > { %s1409_s16 = scalar_lea.hbm %s1749_s25, 512  ;;  %s1413_s29 = scalar_lea.hbm %s1827_s11, 2048 }
 0x406   : > { %p1410_p0 = scmp.ne.s32.totalorder %s1749_s25, %s1409_s16  ;;  %p1414_p10 = scmp.lt.s32.totalorder %s1749_s25, %s1827_s11 }
 0x407   : > { %p1415_p8 = scmp.lt.s32.totalorder %s1413_s29, %s1409_s16 }
 0x408   : > { %p1411_p1 = pnand %p1410_p0, %p1601_p9 }
 0x409   : > { %p1416_p13 = por %p1415_p8, %p1414_p10 }
 0x40a   : > { %p1412_p7 = pneg %p1411_p1 }
 0x40c   : > { %p1417_p2 = pnand %p1416_p13, %p1412_p7 }
 0x40e   : > { %1420 = shalt.err (!%p1417_p2)
}
 0x40f   : > { %s1487_s27 = smov 256   ;;  %s1488_s14 = smov 1024  }
 0x410   : > { %s1489_s15 = smov 16  }
 0x411   : > { %1267 = dma.vmem_to_hbm [thread:$0]  (%p1601_p9), %s1744_s21, 512, %s1749_s25, %s1079_s26, %s1487_s27, %s1488_s14, %s1489_s15  }
 0x412 PF: > { %s1828_s20 = sld [smem:[#allocation12_spill]]  ;;  %p1281_p12 = scmp.ge.s32.totalorder %s1479_s22, 2 }
 0x414   : > { %p1277_p3 = pnand %p1281_p12, %p1608_p11 }
 0x416   : > { %p1278_p5 = pneg %p1277_p3 }
 0x418   : > { %s1107_s19 = sand.u32 1, %s1828_s20  }
 0x419   : > { %s1108_s12 = scalar_lea.sflag [#allocation5], %s1107_s19 }
 0x41a   : > { %1454 = dma.done.wait (%p1278_p5), %s1108_s12, 512  }
 0x41b   : > { %1456 = vsyncadd (%p1278_p5), %s1108_s12, 4294966784  ;;  %s30_s22 = sadd.s32 1, %s1479_s22   ;;  %s1829_s16 = sld [smem:[#allocation13_spill]] }
 0x41c   : > { %p27_p6 = scmp.ge.s32.totalorder %s30_s22, 6   ;;  %s1830_s19 = sld [smem:[#allocation16_spill]] }
 0x41d   : > { %s1831_s20 = sld [smem:[#allocation14_spill]]  ;;  %s1833_s17 = smov %s1463_s18 }
 0x41e   : > { %s1832_s21 = sld [smem:[#allocation15_spill]]  ;;  %29 = sbr.rel (!%p27_p6) target bundleno = 11 (0xb), region = 125 }
 0x421   : > { %s1834_s18 = smov %s1829_s16 }
 0x423   :  { %1113 = vsyncpa [#allocation4], 1 }
 0x424   :  { %1115 = vsyncpa [#allocation4 + $0x1], 1 }
 0x425   :  { %1116 = vsyncpa [#allocation7], 1 }
 0x426   :  { %1118 = vsyncpa [#allocation7 + $0x1], 1 }
 0x427   :  { %1119 = vsyncpa [#allocation5], 1 }
 0x428   :  { %1121 = vsyncpa [#allocation5 + $0x1], 1 }

</bundles_post_ra>
